<compile_context>
chip_gen: v7x
topology: tpu7x:2x2x1
jax: 0.10.0
libtpu: 0.0.40
codegen_flags: <defaults>
</compile_context>

<pallas_src>
import functools
import math

import jax
import jax.numpy as jnp
from jax.experimental import pallas as pl
from jax.experimental.pallas import tpu as pltpu


def _interaction_attention_kernel(feat_ref, wqkv_ref, bqkv_ref, out_ref, *,
                                  batch, seq, dim):
    # feat_ref : (B*S, D)  float32   flattened feature
    # wqkv_ref : (D, 3D)   float32   [Wq.T * 1/sqrt(D) | Wk.T | Wv.T]
    # bqkv_ref : (1, 3D)   float32   [bq * 1/sqrt(D)   | bk   | bv  ]
    # out_ref  : (B*S, D)  float32   lane-dense 2-D output (reshaped in wrapper)
    feat = feat_ref[...]                                           # (B*S, D)

    # Single fused QKV projection over ALL B*S rows (one MXU push/drain,
    # 96-wide result instead of 3x 32-wide, one broadcast bias add).
    qkv = jnp.dot(feat, wqkv_ref[...],
                  preferred_element_type=jnp.float32) + bqkv_ref[...]
    q = qkv[:, 0:dim]             # 1/sqrt(D) already folded into these columns
    k = qkv[:, dim:2 * dim]
    v = qkv[:, 2 * dim:3 * dim]

    # Statically unrolled per-batch attention using clean 2-D MXU matmuls —
    # no 3-D reshapes / batched dot_general relayouts.
    for b in range(batch):
        lo, hi = b * seq, (b + 1) * seq                  # static Python slices
        q_b = q[lo:hi, :]                                # (S, D)
        k_b = k[lo:hi, :]                                # (S, D)
        v_b = v[lo:hi, :]                                # (S, D)

        # scores = (Q / sqrt(D)) @ K^T, contracting the feature dims directly.
        scores = jax.lax.dot_general(
            q_b, k_b, (((1,), (1,)), ((), ())),
            preferred_element_type=jnp.float32)          # (S, S)

        # Numerically stabilized softmax over the key axis (exact divide).
        s_max = jnp.max(scores, axis=-1, keepdims=True)
        e = jnp.exp(scores - s_max)
        denom = jnp.sum(e, axis=-1, keepdims=True)
        attn = e / denom                                 # (S, S)
        # TODO(synk): dropout on `attn` omitted (identity in eval mode).

        out_b = jnp.dot(attn, v_b,
                        preferred_element_type=jnp.float32)        # (S, D)
        # Residual add and store, all 2-D.
        out_ref[lo:hi, :] = (feat[lo:hi, :] + out_b).astype(out_ref.dtype)


def interaction_attention_pallas(feature, wq, wk, wv, bq, bk, bv):
    """feature: (B, S, D); wq/wk/wv: nn.Linear weights (D, D); b*: (D,)."""
    B, S, D = feature.shape
    scale = jnp.float32(1.0 / math.sqrt(D))

    # Fused, pre-transposed QKV weight (D, 3D) with the 1/sqrt(D) score scale
    # folded into the Q slice (weight AND bias) at trace time.
    wqkv = jnp.concatenate(
        [wq.T * scale, wk.T, wv.T], axis=1).astype(jnp.float32)      # (D, 3D)
    bqkv = jnp.concatenate(
        [bq * scale, bk, bv], axis=0)[None, :].astype(jnp.float32)   # (1, 3D)

    feat2 = feature.reshape(B * S, D)                    # flatten in wrapper

    kernel = functools.partial(
        _interaction_attention_kernel, batch=B, seq=S, dim=D)

    out2 = pl.pallas_call(
        kernel,
        out_shape=jax.ShapeDtypeStruct((B * S, D), feature.dtype),
        grid=(1,),                 # single step: whole (tiny) batch resident
        in_specs=[
            pl.BlockSpec((B * S, D), lambda i: (0, 0)),      # feature (2-D)
            pl.BlockSpec((D, 3 * D), lambda i: (0, 0)),      # fused Wqkv
            pl.BlockSpec((1, 3 * D), lambda i: (0, 0)),      # fused bias
        ],
        out_specs=pl.BlockSpec((B * S, D), lambda i: (0, 0)),
        input_output_aliases={0: 0},   # reuse feature's HBM buffer for output
        compiler_params=pltpu.CompilerParams(
            dimension_semantics=("arbitrary",)),
    )(feat2, wqkv, bqkv)

    return out2.reshape(B, S, D)


def interaction_attention_reference(feature, wq, wk, wv, bq, bk, bv):
    """Pure-JAX mirror of the PyTorch forward (dropout = identity)."""
    q = feature @ wq.T + bq
    k = feature @ wk.T + bk
    v = feature @ wv.T + bv
    scores = jnp.einsum('bqd,bkd->bqk', q, k) / math.sqrt(feature.shape[-1])
    attn = jax.nn.softmax(scores, axis=-1)
    return feature + jnp.einsum('bqk,bkd->bqd', attn, v)


if __name__ == "__main__":
    # Small shapes consistent with the module: args.embedding_dim = 32,
    # feature = (batch, seq, embedding_dim) = (2, 8, 32).
    B, S, D = 2, 8, 32

    key = jax.random.PRNGKey(0)
    k_feat, k_q, k_k, k_v, k_bq, k_bk, k_bv = jax.random.split(key, 7)

    feature = jax.random.normal(k_feat, (B, S, D), dtype=jnp.float32)
    # Deterministic synthetic stand-ins for nn.Linear params
    # (PyTorch layout: weight is (out_features, in_features); Linear(x)=x@W.T+b).
    wq = jax.random.normal(k_q, (D, D), dtype=jnp.float32) * 0.1
    wk = jax.random.normal(k_k, (D, D), dtype=jnp.float32) * 0.1
    wv = jax.random.normal(k_v, (D, D), dtype=jnp.float32) * 0.1
    bq = jax.random.normal(k_bq, (D,), dtype=jnp.float32) * 0.1
    bk = jax.random.normal(k_bk, (D,), dtype=jnp.float32) * 0.1
    bv = jax.random.normal(k_bv, (D,), dtype=jnp.float32) * 0.1

    out = interaction_attention_pallas(feature, wq, wk, wv, bq, bk, bv)
    out = jax.block_until_ready(out)

    ref = interaction_attention_reference(feature, wq, wk, wv, bq, bk, bv)
    assert out.shape == (B, S, D)
    assert jnp.allclose(out, ref, atol=1e-5, rtol=1e-5), "mismatch vs reference"

    print("KERNEL_OK")
</pallas_src>

<mosaic_0001>
module attributes {stable_mosaic.version = 11 : i64} {
  func.func @_interaction_attention_kernel(%arg0: i32, %arg1: memref<16x32xf32, #tpu.memory_space<vmem>>, %arg2: memref<32x96xf32, #tpu.memory_space<vmem>>, %arg3: memref<1x96xf32, #tpu.memory_space<vmem>>, %arg4: memref<16x32xf32, #tpu.memory_space<vmem>>) attributes {dimension_semantics = [#tpu.dimension_semantics<arbitrary>], iteration_bounds = array<i64: 1>, scalar_prefetch = 0 : i64, scratch_operands = 0 : i64, tpu.core_type = #tpu.core_type<tc>, window_params = [{pipeline_mode = #tpu.pipeline_mode<synchronous>, transform_indices = @transform_0, window_bounds = array<i64: 16, 32>}, {pipeline_mode = #tpu.pipeline_mode<synchronous>, transform_indices = @transform_1, window_bounds = array<i64: 32, 96>}, {pipeline_mode = #tpu.pipeline_mode<synchronous>, transform_indices = @transform_2, window_bounds = array<i64: 1, 96>}, {pipeline_mode = #tpu.pipeline_mode<synchronous>, transform_indices = @transform_3, window_bounds = array<i64: 16, 32>}]} {
    %c0 = arith.constant 0 : index
    %c0_0 = arith.constant 0 : index
    %0 = vector.load %arg1[%c0, %c0_0] : memref<16x32xf32, #tpu.memory_space<vmem>>, vector<16x32xf32>
    %c0_1 = arith.constant 0 : index
    %c0_2 = arith.constant 0 : index
    %1 = vector.load %arg2[%c0_1, %c0_2] : memref<32x96xf32, #tpu.memory_space<vmem>>, vector<32x96xf32>
    %cst = arith.constant dense<0.000000e+00> : vector<16x96xf32>
    %2 = tpu.matmul %0, %1, %cst {dimension_numbers = #tpu.dot_dimension_numbers<[1], [0], [0], [1], [0, 0, 1, 1], [], []>} : vector<16x32xf32>, vector<32x96xf32>, vector<16x96xf32> -> vector<16x96xf32>
    %c0_3 = arith.constant 0 : index
    %c0_4 = arith.constant 0 : index
    %3 = vector.load %arg3[%c0_3, %c0_4] : memref<1x96xf32, #tpu.memory_space<vmem>>, vector<1x96xf32>
    %4 = vector.broadcast %3 : vector<1x96xf32> to vector<16x96xf32>
    %5 = arith.addf %2, %4 : vector<16x96xf32>
    %6 = vector.extract_strided_slice %5 {offsets = [0, 0], sizes = [16, 32], strides = [1, 1]} : vector<16x96xf32> to vector<16x32xf32>
    %7 = vector.extract_strided_slice %5 {offsets = [0, 32], sizes = [16, 32], strides = [1, 1]} : vector<16x96xf32> to vector<16x32xf32>
    %8 = vector.extract_strided_slice %5 {offsets = [0, 64], sizes = [16, 32], strides = [1, 1]} : vector<16x96xf32> to vector<16x32xf32>
    %9 = vector.extract_strided_slice %6 {offsets = [0, 0], sizes = [8, 32], strides = [1, 1]} : vector<16x32xf32> to vector<8x32xf32>
    %10 = vector.extract_strided_slice %7 {offsets = [0, 0], sizes = [8, 32], strides = [1, 1]} : vector<16x32xf32> to vector<8x32xf32>
    %11 = vector.extract_strided_slice %8 {offsets = [0, 0], sizes = [8, 32], strides = [1, 1]} : vector<16x32xf32> to vector<8x32xf32>
    %cst_5 = arith.constant dense<0.000000e+00> : vector<8x8xf32>
    %12 = tpu.matmul %9, %10, %cst_5 {dimension_numbers = #tpu.dot_dimension_numbers<[1], [1], [0], [0], [0, 0, 1, 0], [], []>} : vector<8x32xf32>, vector<8x32xf32>, vector<8x8xf32> -> vector<8x8xf32>
    %cst_6 = arith.constant dense<0xFF800000> : vector<8xf32>
    %13 = vector.multi_reduction <maximumf>, %12, %cst_6 [1] : vector<8x8xf32> to vector<8xf32>
    %14 = vector.shape_cast %13 : vector<8xf32> to vector<8x1xf32>
    %15 = vector.broadcast %14 : vector<8x1xf32> to vector<8x8xf32>
    %16 = arith.subf %12, %15 : vector<8x8xf32>
    %17 = math.exp %16 : vector<8x8xf32>
    %cst_7 = arith.constant dense<0.000000e+00> : vector<8xf32>
    %18 = vector.multi_reduction <add>, %17, %cst_7 [1] : vector<8x8xf32> to vector<8xf32>
    %19 = vector.shape_cast %18 : vector<8xf32> to vector<8x1xf32>
    %20 = vector.broadcast %19 : vector<8x1xf32> to vector<8x8xf32>
    %21 = arith.divf %17, %20 : vector<8x8xf32>
    %cst_8 = arith.constant dense<0.000000e+00> : vector<8x32xf32>
    %22 = tpu.matmul %21, %11, %cst_8 {dimension_numbers = #tpu.dot_dimension_numbers<[1], [0], [0], [1], [0, 0, 1, 1], [], []>} : vector<8x8xf32>, vector<8x32xf32>, vector<8x32xf32> -> vector<8x32xf32>
    %23 = vector.extract_strided_slice %0 {offsets = [0, 0], sizes = [8, 32], strides = [1, 1]} : vector<16x32xf32> to vector<8x32xf32>
    %24 = arith.addf %23, %22 : vector<8x32xf32>
    %c0_9 = arith.constant 0 : index
    %c0_10 = arith.constant 0 : index
    %25 = vector.load %arg4[%c0_9, %c0_10] : memref<16x32xf32, #tpu.memory_space<vmem>>, vector<8x32xf32>
    tpu.vector_store %arg4[%c0_9, %c0_10], %24 {strides = array<i32>} : memref<16x32xf32, #tpu.memory_space<vmem>>, vector<8x32xf32>,
    %26 = vector.extract_strided_slice %6 {offsets = [8, 0], sizes = [8, 32], strides = [1, 1]} : vector<16x32xf32> to vector<8x32xf32>
    %27 = vector.extract_strided_slice %7 {offsets = [8, 0], sizes = [8, 32], strides = [1, 1]} : vector<16x32xf32> to vector<8x32xf32>
    %28 = vector.extract_strided_slice %8 {offsets = [8, 0], sizes = [8, 32], strides = [1, 1]} : vector<16x32xf32> to vector<8x32xf32>
    %cst_11 = arith.constant dense<0.000000e+00> : vector<8x8xf32>
    %29 = tpu.matmul %26, %27, %cst_11 {dimension_numbers = #tpu.dot_dimension_numbers<[1], [1], [0], [0], [0, 0, 1, 0], [], []>} : vector<8x32xf32>, vector<8x32xf32>, vector<8x8xf32> -> vector<8x8xf32>
    %cst_12 = arith.constant dense<0xFF800000> : vector<8xf32>
    %30 = vector.multi_reduction <maximumf>, %29, %cst_12 [1] : vector<8x8xf32> to vector<8xf32>
    %31 = vector.shape_cast %30 : vector<8xf32> to vector<8x1xf32>
    %32 = vector.broadcast %31 : vector<8x1xf32> to vector<8x8xf32>
    %33 = arith.subf %29, %32 : vector<8x8xf32>
    %34 = math.exp %33 : vector<8x8xf32>
    %cst_13 = arith.constant dense<0.000000e+00> : vector<8xf32>
    %35 = vector.multi_reduction <add>, %34, %cst_13 [1] : vector<8x8xf32> to vector<8xf32>
    %36 = vector.shape_cast %35 : vector<8xf32> to vector<8x1xf32>
    %37 = vector.broadcast %36 : vector<8x1xf32> to vector<8x8xf32>
    %38 = arith.divf %34, %37 : vector<8x8xf32>
    %cst_14 = arith.constant dense<0.000000e+00> : vector<8x32xf32>
    %39 = tpu.matmul %38, %28, %cst_14 {dimension_numbers = #tpu.dot_dimension_numbers<[1], [0], [0], [1], [0, 0, 1, 1], [], []>} : vector<8x8xf32>, vector<8x32xf32>, vector<8x32xf32> -> vector<8x32xf32>
    %40 = vector.extract_strided_slice %0 {offsets = [8, 0], sizes = [8, 32], strides = [1, 1]} : vector<16x32xf32> to vector<8x32xf32>
    %41 = arith.addf %40, %39 : vector<8x32xf32>
    %c8 = arith.constant 8 : index
    %c0_15 = arith.constant 0 : index
    %42 = vector.load %arg4[%c8, %c0_15] : memref<16x32xf32, #tpu.memory_space<vmem>>, vector<8x32xf32>
    tpu.vector_store %arg4[%c8, %c0_15], %41 {strides = array<i32>} : memref<16x32xf32, #tpu.memory_space<vmem>>, vector<8x32xf32>,
    return
  }
  func.func @transform_0(%arg0: i32) -> (i32, i32) {
    %c0_i32 = arith.constant 0 : i32
    %c0_i32_0 = arith.constant 0 : i32
    %c0_i32_1 = arith.constant 0 : i32
    return %c0_i32, %c0_i32_0 : i32, i32
  }
  func.func @transform_1(%arg0: i32) -> (i32, i32) {
    %c0_i32 = arith.constant 0 : i32
    %c0_i32_0 = arith.constant 0 : i32
    %c0_i32_1 = arith.constant 0 : i32
    return %c0_i32, %c0_i32_0 : i32, i32
  }
  func.func @transform_2(%arg0: i32) -> (i32, i32) {
    %c0_i32 = arith.constant 0 : i32
    %c0_i32_0 = arith.constant 0 : i32
    %c0_i32_1 = arith.constant 0 : i32
    return %c0_i32, %c0_i32_0 : i32, i32
  }
  func.func @transform_3(%arg0: i32) -> (i32, i32) {
    %c0_i32 = arith.constant 0 : i32
    %c0_i32_0 = arith.constant 0 : i32
    %c0_i32_1 = arith.constant 0 : i32
    return %c0_i32, %c0_i32_0 : i32, i32
  }
}

</mosaic_0001>

<bundles_post_ra>
// kernel: tpu_custom_call.1
= control target key start
LH: loop header
LB: loop body
LE: loop exit
PB: predicated region body
PF: predicated region fallthrough
CT: control target
= control target key end

     0   :  { %8 = vsyncpa [#allocation3], 0  ;;  %s699_s0 = inlined_call_operand.hbm [shape: f32[16,32], index: 0, kind: input, shape index: {}, may-alias: {0,3}]   ;;  %s700_s1 = inlined_call_operand.vmem [shape: f32[32,96], index: 1, kind: input, shape index: {}]   ;;  %s701_s2 = inlined_call_operand.vmem [shape: f32[1,96], index: 2, kind: input, shape index: {}]   ;;  %s702_s3 = inlined_call_operand.hbm [shape: f32[16,32], index: 3, kind: output, shape index: {}, may-alias: {0,3}]  }
   0x1   :  { %9 = vsyncpa [#allocation4], 0  ;;  %s600_s12 = smov [#allocation2]   ;;  %s552_s16 = scalar_lea.hbm %s699_s0, 256 }
   0x2   :  { %s15_s13 = sshll.u32 %s600_s12, 4  ;;  %p553_p0 = scmp.ne.s32.totalorder %s699_s0, %s552_s16  ;;  %s16_s13 = int_to_ptr.vmem [resolvable:$true] %s15_s13 }
   0x3   :  { %p556_p1 = scmp.lt.u32.totalorder %s552_s16, %s699_s0 }
   0x5   :  { %p558_p2 = pnand %p556_p1, %p553_p0 }
   0x7   :  { %561 = shalt.err (!%p558_p2)
}
   0x8   :  { %s562_s21 = scalar_lea.vmem %s16_s13, 256  ;;  %p567_p4 = scmp.lt.s32.totalorder %s16_s13, %s16_s13 }
   0x9   :  { %p563_p3 = scmp.ne.s32.totalorder %s16_s13, %s562_s21  ;;  %p568_p5 = scmp.lt.s32.totalorder %s562_s21, %s562_s21 }
   0xb   :  { %p569_p6 = por %p568_p5, %p567_p4 }
   0xd   :  { %p570_p7 = pnand %p569_p6, %p563_p3 }
   0xf   :  { %573 = shalt.err (!%p570_p7)
}
  0x10   :  { %s601_s22 = smov 128   ;;  %s602_s23 = smov 8  }
  0x11   :  { %21 = dma.hbm_to_vmem [thread:$0]  %s699_s0, 256, %s16_s13, [#allocation3], %s601_s22, %s601_s22, %s602_s23  }
  0x12   :  { %596 = dma.done.wait [#allocation3], 256  }
  0x13   :  { %597 = vsyncadd [#allocation3], 4294967040  ;;  %vm42_vm0 = vcmask 261120   ;;  %v31_v0 = vld [vmem:[%s700_s1] sm:$0xff]  ;;  %v32_v1 = vld [vmem:[%s700_s1 + $0x8] sm:$0xff]  ;;  %v603_v8 = vmov 0.0  }
  0x14   :  { %v33_v2 = vld [vmem:[%s700_s1 + $0x10] sm:$0xff]  ;;  %v528_v3 = vpack.c.bf16 %v32_v1, %v31_v0  ;;  %v34_v4 = vld [vmem:[%s700_s1 + $0x18] sm:$0xff]  ;;  %v655_v5 = vld [vmem:[#allocation2] sm:$0xff]  ;;  %508 = vmatprep.subr.mxu1 %v603_v8  ;;  %vm604_vm1 = vmmov 0   ;;  %s605_s7 = smov 96   ;;  %vm201_vm2 = vcmask 64512  }
  0x15   :  { %v532_v6 = vpack.c.bf16 %v34_v4, %v33_v2  ;;  %505 = vmatprep.mubr.msk.f32.mxu0 %vm42_vm0, %v655_v5  ;;  %v659_v7 = vld [vmem:[#allocation2 + $0x8] sm:$0xff]  ;;  %510 = vmatprep.mubr.msk.f32.mxu1 %vm604_vm1, %v603_v8  ;;  %v474_v9 = vld [vmem:[%s701_s2] ss:$0 sm:$0xff]  ;;  %s606_s2 = smov 64   ;;  %s607_s8 = smov [#allocation5]  }
  0x16   :  { %529 = vmatprep.subr.bf16.mxu0 %v528_v3  ;;  %s462_s9 = sshll.u32 %s607_s8, 4  ;;  %s463_s9 = int_to_ptr.vmem [resolvable:$true] %s462_s9 }
  0x17   :  { %531 = vmatpush3.bf16.msra.mxu0 %v528_v3  ;;  %s574_s10 = scalar_lea.vmem %s463_s9, 256  ;;  %p579_p9 = scmp.lt.s32.totalorder %s463_s9, %s463_s9 }
  0x18   :  { %533 = vmatprep.subr.bf16.mxu0 %v532_v6  ;;  %p575_p8 = scmp.ne.s32.totalorder %s463_s9, %s574_s10  ;;  %p580_p10 = scmp.lt.s32.totalorder %s574_s10, %s574_s10 }
  0x1a   :  { %p581_p11 = por %p580_p10, %p579_p9 }
  0x1b   :  { %535 = vmatpush3.bf16.msra.mxu0 %v532_v6 }
  0x1c   :  { %518 = vmatprep.subr.mxu0 %v603_v8  ;;  %p582_p12 = pnand %p581_p11, %p575_p8 }
  0x1e   :  { %506 = vmatmul.mubr.msk.f32.vlgmr.msra.gmra.mrb[0].mxu0 %vm42_vm0, %v659_v7 }
  0x1f   :  { %520 = vmatprep.mubr.msk.f32.mxu0 %vm604_vm1, %v603_v8 }
  0xf1   :  { %v507_v10 = vpop.f32.mrb[0].mxu0 }
  0xf2   :  { %v115_v11 = vpop.f32.mrb[1].mxu0  ;;  %v121_v13 = vadd.f32 %v507_v10, %v474_v9 }
  0xf3   :  { %v116_v12 = vadd.f32 %v474_v9, %v115_v11 }
  0xf5   :  { %125 = vrot.lane.b32.xlu0 %v116_v12, %s605_s7 }
  0xf9   :  { %292 = vrot.lane.b32.xlu0 %v121_v13, %s605_s7 }
 0x167   :  { %v126_v14 = vpop.permute.xlu0 %125 }
 0x168   :  { %509 = vmatpush3.xpose.msk.msra.mxu1 %vm42_vm0, %v126_v14 }
 0x169   :  { %513 = vmatprep.subr.mxu1 %v603_v8 }
 0x16b   :  { %511 = vmatmul.mubr.msk.f32.vlgmr.msra.gmra.mrb[0].mxu1 %vm42_vm0, %v116_v12  ;;  %v293_v15 = vpop.permute.xlu0 %292 }
 0x16c   :  { %519 = vmatpush3.xpose.msk.msra.mxu0 %vm42_vm0, %v293_v15  ;;  %515 = vmatprep.mubr.msk.f32.mxu1 %vm604_vm1, %v603_v8 }
 0x16f   :  { %521 = vmatmul.mubr.msk.f32.vlgmr.msra.gmra.mrb[2].mxu0 %vm42_vm0, %v121_v13 }
 0x23e   :  { %v197_v16 = vpop.f32.mrb[0].mxu1 }
 0x23f   :  { %v512_v17 = vpop.f32.mrb[1].mxu1  ;;  %v202_v18 = vsel %vm201_vm2, %v197_v16, -inf }
 0x240   :  { %203 = vmax.xlane.f32.xlu1 %v202_v18 }
 0x242   :  { %v364_v19 = vpop.f32.mrb[2].mxu0 }
 0x243   :  { %v522_v20 = vpop.f32.mrb[3].mxu0  ;;  %v368_v21 = vsel %vm201_vm2, %v364_v19, -inf }
 0x244   :  { %369 = vmax.xlane.f32.xlu1 %v368_v21 }
 0x2cd   :  { %v204_v22 = vpop.xlane.xlu1 %203 }
 0x2ce   :  { %v205_v23 = vsub.f32 %v197_v16, %v204_v22 }
 0x2d0   :  { %v206_v24 = vmul.f32 1.442695, %v205_v23 }
 0x2d1   :  { %v370_v25 = vpop.xlane.xlu1 %369 }
 0x2d2   :  { %544 = vpow2.f32 %v206_v24  ;;  %v371_v26 = vsub.f32 %v364_v19, %v370_v25 }
 0x2d4   :  { %v372_v27 = vmul.f32 1.442695, %v371_v26 }
 0x2d6   :  { %546 = vpow2.f32 %v372_v27 }
 0x2dc   :  { %v545_v28 = vpop.eup %544 }
 0x2dd   :  { %v208_v29 = vsel %vm201_vm2, %v545_v28, 0.0 }
 0x2de   :  { %209 = vadd.xlane.f32.xlu0 %v208_v29 }
 0x2e0   :  { %v547_v30 = vpop.eup %546 }
 0x2e1   :  { %v374_v31 = vsel %vm201_vm2, %v547_v30, 0.0 }
 0x2e2   :  { %375 = vadd.xlane.f32.xlu1 %v374_v31 }
 0x2f3   :  { %213 = vrot.lane.b32.xlu1 %v116_v12, %s606_s2 }
 0x2f7   :  { %379 = vrot.lane.b32.xlu1 %v121_v13, %s606_s2 }
 0x36b   :  { %v210_v32 = vpop.xlane.xlu0 %209 }
 0x36c   :  { %548 = vrcp.f32 %v210_v32 }
 0x36f   :  { %v376_v33 = vpop.xlane.xlu1 %375 }
 0x370   :  { %550 = vrcp.f32 %v376_v33 }
 0x373   :  { %v214_v34 = vpop.permute.xlu1 %213 }
 0x374   :  { %514 = vmatpush3.msra.mxu1 %v214_v34 }
 0x375   :  { %523 = vmatprep.subr.mxu1 %v603_v8 }
 0x376   :  { %v549_v35 = vpop.eup %548 }
 0x377   :  { %v212_v36 = vmul.f32 %v549_v35, %v545_v28  ;;  %v380_v37 = vpop.permute.xlu1 %379 }
 0x379   :  { %516 = vmatmul.mubr.msk.f32.vlgmr.msra.gmra.mrb[2].mxu1 %vm201_vm2, %v212_v36 }
 0x37a   :  { %v551_v38 = vpop.eup %550  ;;  %524 = vmatpush3.msra.mxu1 %v380_v37  ;;  %525 = vmatprep.mubr.msk.f32.mxu1 %vm604_vm1, %v603_v8 }
 0x37b   :  { %v378_v39 = vmul.f32 %v551_v38, %v547_v30 }
 0x37d   :  { %526 = vmatmul.mubr.msk.f32.vlgmr.msra.gmra.mrb[4].mxu1 %vm201_vm2, %v378_v39 }
 0x44c   :  { %v285_v40 = vpop.f32.mrb[2].mxu1 }
 0x44d   :  { %v289_v41 = vadd.f32 %v285_v40, %v655_v5  ;;  %v517_v42 = vpop.f32.mrb[3].mxu1 }
 0x44f   :  { %290 = vst.msk [vmem:[#allocation5] sm:$0xff] %vm42_vm0, %v289_v41 }
 0x450   :  { %v451_v43 = vpop.f32.mrb[4].mxu1 }
 0x451   :  { %v455_v44 = vadd.f32 %v451_v43, %v659_v7  ;;  %v527_v45 = vpop.f32.mrb[5].mxu1 }
 0x453   :  { %456 = vst.msk [vmem:[#allocation5 + $0x8] sm:$0xff] %vm42_vm0, %v455_v44 }
 0x454   :  { %585 = shalt.err (!%p582_p12)
}
 0x455   :  { %s586_s13 = scalar_lea.hbm %s702_s3, 256 }
 0x456   :  { %p587_p13 = scmp.ne.s32.totalorder %s702_s3, %s586_s13  ;;  %p590_p0 = scmp.lt.u32.totalorder %s586_s13, %s702_s3 }
 0x458   :  { %p592_p1 = pnand %p590_p0, %p587_p13 }
 0x45a   :  { %595 = shalt.err (!%p592_p1)
}
 0x45b   :  { %468 = dma.vmem_to_hbm [thread:$0]  %s463_s9, 256, %s702_s3, [#allocation4], %s601_s22, %s601_s22, %s602_s23  }
 0x45c   :  { %598 = dma.done.wait [#allocation4], 256  }
 0x45d   :  { %599 = vsyncadd [#allocation4], 4294967040 }
 0x45e   :  { %472 = vsyncpa [#allocation3], 1 }
 0x45f   :  { %473 = vsyncpa [#allocation4], 1 }

</bundles_post_ra>
